<compile_context>
chip_gen: v6e
topology: v6e:2x2x1
jax: 0.10.0
libtpu: 0.0.40
codegen_flags: <defaults>
</compile_context>

<pallas_src>
import functools
import math

import jax
import jax.numpy as jnp
import numpy as np
from jax.experimental import pallas as pl
from jax.experimental.pallas import tpu as pltpu


def _angular_penalty_kernel(x_ref, w_ref, labels_ref, loss_ref,
                            m_sc, ssum_sc, t_sc, *,
                            s, m, eps, loss_type, c_actual, tile_c):
    kc = pl.program_id(1)
    n_kc = pl.num_programs(1)

    @pl.when(kc == 0)
    def _init():
        m_sc[...] = jnp.full_like(m_sc, -1e30)      # running max of s*wf per row
        ssum_sc[...] = jnp.zeros_like(ssum_sc)      # shifted sum of exp(s*wf) per row
        t_sc[...] = jnp.zeros_like(t_sc)            # target cosine per row

    xn = x_ref[...]                                 # (tile_n, D)  (already L2-normalized)
    wn = w_ref[...]                                 # (tile_c, D)  (already L2-normalized)

    # Cosine logits for this class tile.  Contract last dims of both operands directly
    # (equivalent to xn @ wn.T) so no transpose/relayout of the W tile is needed.
    wf = jax.lax.dot_general(xn, wn, dimension_numbers=(((1,), (1,)), ((), ())),
                             preferred_element_type=jnp.float32)   # (tile_n, tile_c) f32

    tile_n = wf.shape[0]
    labels = labels_ref[...]                        # (tile_n, 1) int32
    col = kc * tile_c + jax.lax.broadcasted_iota(jnp.int32, (tile_n, tile_c), 1)

    # Accumulate the target cosine wf[i, labels[i]] via a per-tile label compare.
    # (labels < c_actual always, so padded class columns never match.)
    t_sc[...] += jnp.sum(jnp.where(col == labels, wf, 0.0), axis=1, keepdims=True)

    logits = s * wf
    if c_actual % tile_c != 0:
        # Mask out padded (nonexistent) class columns so they don't enter the exp-sum.
        logits = jnp.where(col < c_actual, logits, -1e30)

    # Online (running-max) accumulation of sum_j exp(s * wf[:, j]) over class tiles.
    m_prev = m_sc[...]
    m_new = jnp.maximum(m_prev, jnp.max(logits, axis=1, keepdims=True))
    alpha = jnp.exp(m_prev - m_new)
    ssum_sc[...] = alpha * ssum_sc[...] + jnp.sum(jnp.exp(logits - m_new),
                                                  axis=1, keepdims=True)
    m_sc[...] = m_new

    @pl.when(kc == n_kc - 1)
    def _finalize():
        t_raw = t_sc[...]
        if loss_type == "cosface":
            numerator = s * (t_raw - m)
        elif loss_type == "arcface":
            t = jnp.clip(t_raw, -1.0 + eps, 1.0 - eps)
            # cos(acos(t) + m) == t*cos(m) - sqrt(1 - t^2)*sin(m)  (exact identity)
            numerator = s * (t * math.cos(m) - jnp.sqrt(1.0 - t * t) * math.sin(m))
        else:
            # TODO(synk): sphereface needs cos(m*acos(t)) with non-integer m; not implemented.
            raise NotImplementedError(loss_type)

        # denominator = exp(numerator) + sum_j exp(s*wf_j) - exp(s*t)   (exclude label class)
        # evaluated under a max shift so it stays in f32 range for any s / C.
        m_run = m_sc[...]
        shift = jnp.maximum(m_run, numerator)
        denom = (jnp.exp(numerator - shift)
                 + ssum_sc[...] * jnp.exp(m_run - shift)
                 - jnp.exp(s * t_raw - shift))
        loss_ref[...] = numerator - (jnp.log(denom) + shift)   # per-row L, (tile_n, 1)


def _round_up(a, b):
    return -(-a // b) * b


def angular_penalty_sm_loss(x, weight, labels, *, loss_type="arcface",
                            s=None, m=None, eps=1e-7,
                            tile_n=128, tile_c=1024, use_bf16_mxu=True):
    loss_type = loss_type.lower()
    if loss_type == "arcface":
        s = 64.0 if s is None else float(s)
        m = 0.5 if m is None else float(m)
    elif loss_type == "cosface":
        s = 30.0 if s is None else float(s)
        m = 0.4 if m is None else float(m)
    else:
        # TODO(synk): sphereface path not implemented.
        raise NotImplementedError(loss_type)

    N, D = x.shape
    C, D2 = weight.shape
    assert D == D2

    # Hoisted normalization (F.normalize semantics: a / max(||a||, 1e-12)), done once in
    # the surrounding XLA graph instead of per N tile inside the kernel.
    def _l2_normalize(a):
        a = a.astype(jnp.float32)
        ssq = jnp.sum(a * a, axis=1, keepdims=True)
        return a * jax.lax.rsqrt(jnp.maximum(ssq, 1e-24))

    xn = _l2_normalize(x)
    wn = _l2_normalize(weight)
    if use_bf16_mxu:
        # bf16 MXU operands (f32 accumulate): MXU peak + halved HBM traffic for W.
        xn = xn.astype(jnp.bfloat16)
        wn = wn.astype(jnp.bfloat16)

    # Tile sizes: respect the (8, 128) sublane/lane constraints, clamp for tiny shapes.
    tile_n = int(min(tile_n, _round_up(N, 8)))
    tile_c = int(min(tile_c, _round_up(C, 128)))
    n_pad = _round_up(N, tile_n)
    c_pad = _round_up(C, tile_c)

    if n_pad != N:
        xn = jnp.pad(xn, ((0, n_pad - N), (0, 0)))
    if c_pad != C:
        wn = jnp.pad(wn, ((0, c_pad - C), (0, 0)))

    labels2d = labels.astype(jnp.int32).reshape(N, 1)
    if n_pad != N:
        labels2d = jnp.pad(labels2d, ((0, n_pad - N), (0, 0)))

    grid = (n_pad // tile_n, c_pad // tile_c)

    kernel = functools.partial(
        _angular_penalty_kernel, s=s, m=m, eps=float(eps),
        loss_type=loss_type, c_actual=C, tile_c=tile_c)

    # Explicit VMEM budget: double-buffered input tiles + f32 (tile_n, tile_c) temporaries
    # + headroom, clamped to stay well under v7x's 64 MiB physical VMEM.
    op_bytes = 2 if use_bf16_mxu else 4
    est = (2 * op_bytes * (tile_n + tile_c) * D
           + 8 * 4 * tile_n * tile_c
           + 64 * tile_n
           + (4 << 20))
    vmem_limit = int(min(max(est, 16 << 20), 96 << 20))

    L = pl.pallas_call(
        kernel,
        out_shape=jax.ShapeDtypeStruct((n_pad, 1), jnp.float32),
        grid_spec=pltpu.PrefetchScalarGridSpec(
            num_scalar_prefetch=0,
            grid=grid,
            in_specs=[
                pl.BlockSpec((tile_n, D), lambda i, kc: (i, 0)),   # x tile
                pl.BlockSpec((tile_c, D), lambda i, kc: (kc, 0)),  # W tile (streamed over C)
                pl.BlockSpec((tile_n, 1), lambda i, kc: (i, 0)),   # labels
            ],
            out_specs=pl.BlockSpec((tile_n, 1), lambda i, kc: (i, 0)),  # per-row L
            scratch_shapes=[pltpu.VMEM((tile_n, 1), jnp.float32)] * 3,
        ),
        compiler_params=pltpu.CompilerParams(
            dimension_semantics=("parallel", "arbitrary"),
            vmem_limit_bytes=vmem_limit,
        ),
    )(xn, wn, labels2d)

    # Final mean is a cheap reduction done outside the kernel (padded rows sliced off).
    return -jnp.sum(L[:N, 0]) / N


def _reference_loss(x, weight, labels, *, s=64.0, m=0.5, eps=1e-7):
    # Pure-JAX reference mirroring the PyTorch forward (arcface).
    xn = x / jnp.maximum(jnp.linalg.norm(x, axis=1, keepdims=True), 1e-12)
    wn = weight / jnp.maximum(jnp.linalg.norm(weight, axis=1, keepdims=True), 1e-12)
    wf = xn @ wn.T
    t = wf[jnp.arange(x.shape[0]), labels]
    t = jnp.clip(t, -1.0 + eps, 1.0 - eps)
    numerator = s * jnp.cos(jnp.arccos(t) + m)
    onehot = jax.nn.one_hot(labels, weight.shape[0], dtype=x.dtype)
    excl_sum = jnp.sum(jnp.exp(s * wf) * (1.0 - onehot), axis=1)
    L = numerator - jnp.log(jnp.exp(numerator) + excl_sum)
    return -jnp.mean(L)


if __name__ == "__main__":
    key = jax.random.PRNGKey(0)

    # --- Case 1: small shapes consistent with the module forward (single-tile grid). ---
    N, in_features, out_features = 8, 32, 16
    kx, kw, kl, kx2, kw2, kl2 = jax.random.split(key, 6)
    x = jax.random.normal(kx, (N, in_features), dtype=jnp.float32)
    weight = jax.random.normal(kw, (out_features, in_features), dtype=jnp.float32) * 0.1
    labels = jax.random.randint(kl, (N,), 0, out_features, dtype=jnp.int32)

    ref = jax.block_until_ready(_reference_loss(x, weight, labels))

    # Exact-parity path: f32 MXU operands.
    loss_f32 = jax.block_until_ready(
        angular_penalty_sm_loss(x, weight, labels, loss_type="arcface", use_bf16_mxu=False))
    assert np.allclose(np.asarray(loss_f32), np.asarray(ref), rtol=1e-4, atol=1e-4), (loss_f32, ref)

    # Fast path: bf16 MXU operands, f32 accumulate (looser tolerance per bf16 rounding).
    loss_bf16 = jax.block_until_ready(
        angular_penalty_sm_loss(x, weight, labels, loss_type="arcface", use_bf16_mxu=True))
    assert np.allclose(np.asarray(loss_bf16), np.asarray(ref), rtol=0.05, atol=0.5), (loss_bf16, ref)

    # --- Case 2: multi-tile grid over N and C (with C padding), still small shapes. ---
    N2, C2 = 24, 300
    x2 = jax.random.normal(kx2, (N2, in_features), dtype=jnp.float32)
    w2 = jax.random.normal(kw2, (C2, in_features), dtype=jnp.float32) * 0.1
    lbl2 = jax.random.randint(kl2, (N2,), 0, C2, dtype=jnp.int32)

    ref2 = jax.block_until_ready(_reference_loss(x2, w2, lbl2))
    loss2 = jax.block_until_ready(
        angular_penalty_sm_loss(x2, w2, lbl2, loss_type="arcface",
                                tile_n=8, tile_c=128, use_bf16_mxu=False))
    assert np.allclose(np.asarray(loss2), np.asarray(ref2), rtol=5e-4, atol=1e-3), (loss2, ref2)

    print("KERNEL_OK")
</pallas_src>

<mosaic_0001>
module attributes {stable_mosaic.version = 11 : i64} {
  func.func @_angular_penalty_kernel(%arg0: i32, %arg1: i32, %arg2: memref<8x32xf32, #tpu.memory_space<vmem>>, %arg3: memref<128x32xf32, #tpu.memory_space<vmem>>, %arg4: memref<8x1xi32, #tpu.memory_space<vmem>>, %arg5: memref<8x1xf32, #tpu.memory_space<vmem>>, %arg6: memref<8x1xf32, #tpu.memory_space<vmem>>, %arg7: memref<8x1xf32, #tpu.memory_space<vmem>>, %arg8: memref<8x1xf32, #tpu.memory_space<vmem>>) attributes {dimension_semantics = [#tpu.dimension_semantics<parallel>, #tpu.dimension_semantics<arbitrary>], iteration_bounds = array<i64: 1, 1>, scalar_prefetch = 0 : i64, scratch_operands = 3 : i64, tpu.core_type = #tpu.core_type<tc>, window_params = [{transform_indices = @transform_0, window_bounds = array<i64: 8, 32>}, {transform_indices = @transform_1, window_bounds = array<i64: 128, 32>}, {transform_indices = @transform_2, window_bounds = array<i64: 8, 1>}, {transform_indices = @transform_3, window_bounds = array<i64: 8, 1>}]} {
    %c0_i32 = arith.constant 0 : i32
    %0 = arith.cmpi eq, %arg1, %c0_i32 : i32
    %1 = arith.extui %0 : i1 to i32
    %c0_i32_0 = arith.constant 0 : i32
    %2 = arith.cmpi ne, %1, %c0_i32_0 : i32
    scf.if %2 {
      %cst_26 = arith.constant -1.000000e+30 : f32
      %45 = vector.broadcast %cst_26 : f32 to vector<8x1xf32>
      %c0_27 = arith.constant 0 : index
      %c0_28 = arith.constant 0 : index
      %46 = vector.load %arg6[%c0_27, %c0_28] : memref<8x1xf32, #tpu.memory_space<vmem>>, vector<8x1xf32>
      tpu.vector_store %arg6[%c0_27, %c0_28], %45 {strides = array<i32>} : memref<8x1xf32, #tpu.memory_space<vmem>>, vector<8x1xf32>,
      %cst_29 = arith.constant 0.000000e+00 : f32
      %47 = vector.broadcast %cst_29 : f32 to vector<8x1xf32>
      %c0_30 = arith.constant 0 : index
      %c0_31 = arith.constant 0 : index
      %48 = vector.load %arg7[%c0_30, %c0_31] : memref<8x1xf32, #tpu.memory_space<vmem>>, vector<8x1xf32>
      tpu.vector_store %arg7[%c0_30, %c0_31], %47 {strides = array<i32>} : memref<8x1xf32, #tpu.memory_space<vmem>>, vector<8x1xf32>,
      %cst_32 = arith.constant 0.000000e+00 : f32
      %49 = vector.broadcast %cst_32 : f32 to vector<8x1xf32>
      %c0_33 = arith.constant 0 : index
      %c0_34 = arith.constant 0 : index
      %50 = vector.load %arg8[%c0_33, %c0_34] : memref<8x1xf32, #tpu.memory_space<vmem>>, vector<8x1xf32>
      tpu.vector_store %arg8[%c0_33, %c0_34], %49 {strides = array<i32>} : memref<8x1xf32, #tpu.memory_space<vmem>>, vector<8x1xf32>,
    } else {
    }
    %c0 = arith.constant 0 : index
    %c0_1 = arith.constant 0 : index
    %3 = vector.load %arg2[%c0, %c0_1] : memref<8x32xf32, #tpu.memory_space<vmem>>, vector<8x32xf32>
    %c0_2 = arith.constant 0 : index
    %c0_3 = arith.constant 0 : index
    %4 = vector.load %arg3[%c0_2, %c0_3] : memref<128x32xf32, #tpu.memory_space<vmem>>, vector<128x32xf32>
    %cst = arith.constant dense<0.000000e+00> : vector<8x128xf32>
    %5 = tpu.matmul %3, %4, %cst {dimension_numbers = #tpu.dot_dimension_numbers<[1], [1], [0], [0], [0, 0, 1, 0], [], []>} : vector<8x32xf32>, vector<128x32xf32>, vector<8x128xf32> -> vector<8x128xf32>
    %c0_4 = arith.constant 0 : index
    %c0_5 = arith.constant 0 : index
    %6 = vector.load %arg4[%c0_4, %c0_5] : memref<8x1xi32, #tpu.memory_space<vmem>>, vector<8x1xi32>
    %c128_i32 = arith.constant 128 : i32
    %7 = arith.muli %arg1, %c128_i32 : i32
    %8 = tpu.iota {dimensions = array<i32: 1>} : vector<8x128xi32>
    %9 = vector.broadcast %7 : i32 to vector<8x128xi32>
    %10 = arith.addi %9, %8 : vector<8x128xi32>
    %c0_6 = arith.constant 0 : index
    %c0_7 = arith.constant 0 : index
    %11 = vector.load %arg8[%c0_6, %c0_7] : memref<8x1xf32, #tpu.memory_space<vmem>>, vector<8x1xf32>
    %12 = vector.broadcast %6 : vector<8x1xi32> to vector<8x128xi32>
    %13 = arith.cmpi eq, %10, %12 : vector<8x128xi32>
    %cst_8 = arith.constant 0.000000e+00 : f32
    %14 = vector.broadcast %cst_8 : f32 to vector<8x128xf32>
    %15 = arith.select %13, %5, %14 : vector<8x128xi1>, vector<8x128xf32>
    %cst_9 = arith.constant dense<0.000000e+00> : vector<8xf32>
    %16 = vector.multi_reduction <add>, %15, %cst_9 [1] : vector<8x128xf32> to vector<8xf32>
    %17 = vector.shape_cast %16 : vector<8xf32> to vector<8x1xf32>
    %18 = arith.addf %11, %17 : vector<8x1xf32>
    %c0_10 = arith.constant 0 : index
    %c0_11 = arith.constant 0 : index
    %19 = vector.load %arg8[%c0_10, %c0_11] : memref<8x1xf32, #tpu.memory_space<vmem>>, vector<8x1xf32>
    tpu.vector_store %arg8[%c0_10, %c0_11], %18 {strides = array<i32>} : memref<8x1xf32, #tpu.memory_space<vmem>>, vector<8x1xf32>,
    %cst_12 = arith.constant 6.400000e+01 : f32
    %20 = vector.broadcast %cst_12 : f32 to vector<8x128xf32>
    %21 = arith.mulf %20, %5 : vector<8x128xf32>
    %c16_i32 = arith.constant 16 : i32
    %22 = vector.broadcast %c16_i32 : i32 to vector<8x128xi32>
    %23 = arith.cmpi slt, %10, %22 : vector<8x128xi32>
    %cst_13 = arith.constant -1.000000e+30 : f32
    %24 = vector.broadcast %cst_13 : f32 to vector<8x128xf32>
    %25 = arith.select %23, %21, %24 : vector<8x128xi1>, vector<8x128xf32>
    %c0_14 = arith.constant 0 : index
    %c0_15 = arith.constant 0 : index
    %26 = vector.load %arg6[%c0_14, %c0_15] : memref<8x1xf32, #tpu.memory_space<vmem>>, vector<8x1xf32>
    %cst_16 = arith.constant dense<0xFF800000> : vector<8xf32>
    %27 = vector.multi_reduction <maximumf>, %25, %cst_16 [1] : vector<8x128xf32> to vector<8xf32>
    %28 = vector.shape_cast %27 : vector<8xf32> to vector<8x1xf32>
    %29 = arith.maximumf %26, %28 : vector<8x1xf32>
    %30 = arith.subf %26, %29 : vector<8x1xf32>
    %31 = math.exp %30 : vector<8x1xf32>
    %c0_17 = arith.constant 0 : index
    %c0_18 = arith.constant 0 : index
    %32 = vector.load %arg7[%c0_17, %c0_18] : memref<8x1xf32, #tpu.memory_space<vmem>>, vector<8x1xf32>
    %33 = arith.mulf %31, %32 : vector<8x1xf32>
    %34 = vector.broadcast %29 : vector<8x1xf32> to vector<8x128xf32>
    %35 = arith.subf %25, %34 : vector<8x128xf32>
    %36 = math.exp %35 : vector<8x128xf32>
    %cst_19 = arith.constant dense<0.000000e+00> : vector<8xf32>
    %37 = vector.multi_reduction <add>, %36, %cst_19 [1] : vector<8x128xf32> to vector<8xf32>
    %38 = vector.shape_cast %37 : vector<8xf32> to vector<8x1xf32>
    %39 = arith.addf %33, %38 : vector<8x1xf32>
    %c0_20 = arith.constant 0 : index
    %c0_21 = arith.constant 0 : index
    %40 = vector.load %arg7[%c0_20, %c0_21] : memref<8x1xf32, #tpu.memory_space<vmem>>, vector<8x1xf32>
    tpu.vector_store %arg7[%c0_20, %c0_21], %39 {strides = array<i32>} : memref<8x1xf32, #tpu.memory_space<vmem>>, vector<8x1xf32>,
    %c0_22 = arith.constant 0 : index
    %c0_23 = arith.constant 0 : index
    %41 = vector.load %arg6[%c0_22, %c0_23] : memref<8x1xf32, #tpu.memory_space<vmem>>, vector<8x1xf32>
    tpu.vector_store %arg6[%c0_22, %c0_23], %29 {strides = array<i32>} : memref<8x1xf32, #tpu.memory_space<vmem>>, vector<8x1xf32>,
    %c0_i32_24 = arith.constant 0 : i32
    %42 = arith.cmpi eq, %arg1, %c0_i32_24 : i32
    %43 = arith.extui %42 : i1 to i32
    %c0_i32_25 = arith.constant 0 : i32
    %44 = arith.cmpi ne, %43, %c0_i32_25 : i32
    scf.if %44 {
      %c0_26 = arith.constant 0 : index
      %c0_27 = arith.constant 0 : index
      %45 = vector.load %arg8[%c0_26, %c0_27] : memref<8x1xf32, #tpu.memory_space<vmem>>, vector<8x1xf32>
      %cst_28 = arith.constant -0.99999988 : f32
      %cst_29 = arith.constant 0.99999988 : f32
      %46 = vector.broadcast %cst_28 : f32 to vector<8x1xf32>
      %47 = arith.maximumf %46, %45 : vector<8x1xf32>
      %48 = vector.broadcast %cst_29 : f32 to vector<8x1xf32>
      %49 = arith.minimumf %48, %47 : vector<8x1xf32>
      %cst_30 = arith.constant 0.87758255 : f32
      %50 = vector.broadcast %cst_30 : f32 to vector<8x1xf32>
      %51 = arith.mulf %49, %50 : vector<8x1xf32>
      %52 = arith.mulf %49, %49 : vector<8x1xf32>
      %cst_31 = arith.constant 1.000000e+00 : f32
      %53 = vector.broadcast %cst_31 : f32 to vector<8x1xf32>
      %54 = arith.subf %53, %52 : vector<8x1xf32>
      %55 = math.sqrt %54 : vector<8x1xf32>
      %cst_32 = arith.constant 0.47942555 : f32
      %56 = vector.broadcast %cst_32 : f32 to vector<8x1xf32>
      %57 = arith.mulf %55, %56 : vector<8x1xf32>
      %58 = arith.subf %51, %57 : vector<8x1xf32>
      %cst_33 = arith.constant 6.400000e+01 : f32
      %59 = vector.broadcast %cst_33 : f32 to vector<8x1xf32>
      %60 = arith.mulf %59, %58 : vector<8x1xf32>
      %c0_34 = arith.constant 0 : index
      %c0_35 = arith.constant 0 : index
      %61 = vector.load %arg6[%c0_34, %c0_35] : memref<8x1xf32, #tpu.memory_space<vmem>>, vector<8x1xf32>
      %62 = arith.maximumf %61, %60 : vector<8x1xf32>
      %63 = arith.subf %60, %62 : vector<8x1xf32>
      %64 = math.exp %63 : vector<8x1xf32>
      %c0_36 = arith.constant 0 : index
      %c0_37 = arith.constant 0 : index
      %65 = vector.load %arg7[%c0_36, %c0_37] : memref<8x1xf32, #tpu.memory_space<vmem>>, vector<8x1xf32>
      %66 = arith.subf %61, %62 : vector<8x1xf32>
      %67 = math.exp %66 : vector<8x1xf32>
      %68 = arith.mulf %65, %67 : vector<8x1xf32>
      %69 = arith.addf %64, %68 : vector<8x1xf32>
      %cst_38 = arith.constant 6.400000e+01 : f32
      %70 = vector.broadcast %cst_38 : f32 to vector<8x1xf32>
      %71 = arith.mulf %70, %45 : vector<8x1xf32>
      %72 = arith.subf %71, %62 : vector<8x1xf32>
      %73 = math.exp %72 : vector<8x1xf32>
      %74 = arith.subf %69, %73 : vector<8x1xf32>
      %75 = math.log %74 : vector<8x1xf32>
      %76 = arith.addf %75, %62 : vector<8x1xf32>
      %77 = arith.subf %60, %76 : vector<8x1xf32>
      %c0_39 = arith.constant 0 : index
      %c0_40 = arith.constant 0 : index
      %78 = vector.load %arg5[%c0_39, %c0_40] : memref<8x1xf32, #tpu.memory_space<vmem>>, vector<8x1xf32>
      tpu.vector_store %arg5[%c0_39, %c0_40], %77 {strides = array<i32>} : memref<8x1xf32, #tpu.memory_space<vmem>>, vector<8x1xf32>,
    } else {
    }
    return
  }
  func.func @transform_0(%arg0: i32, %arg1: i32) -> (i32, i32) {
    %c0_i32 = arith.constant 0 : i32
    %c0_i32_0 = arith.constant 0 : i32
    return %arg0, %c0_i32 : i32, i32
  }
  func.func @transform_1(%arg0: i32, %arg1: i32) -> (i32, i32) {
    %c0_i32 = arith.constant 0 : i32
    %c0_i32_0 = arith.constant 0 : i32
    return %arg1, %c0_i32 : i32, i32
  }
  func.func @transform_2(%arg0: i32, %arg1: i32) -> (i32, i32) {
    %c0_i32 = arith.constant 0 : i32
    %c0_i32_0 = arith.constant 0 : i32
    return %arg0, %c0_i32 : i32, i32
  }
  func.func @transform_3(%arg0: i32, %arg1: i32) -> (i32, i32) {
    %c0_i32 = arith.constant 0 : i32
    %c0_i32_0 = arith.constant 0 : i32
    return %arg0, %c0_i32 : i32, i32
  }
}

</mosaic_0001>

<bundles_post_ra>
// kernel: tpu_custom_call.1
= control target key start
LH: loop header
LB: loop body
LE: loop exit
PB: predicated region body
PF: predicated region fallthrough
CT: control target
= control target key end

     0   :  { %vm39_vm0 = vcmask 261120   ;;  %v337_v0 = vmov 0.0   ;;  %vm338_vm1 = vmmov 0   ;;  %v339_v18 = vmov 0   ;;  %s442_s1 = inlined_call_operand.vmem [shape: f32[128,32], index: 1, kind: input, shape index: {}]   ;;  %s443_s0 = inlined_call_operand.vmem [shape: f32[8,32], index: 0, kind: input, shape index: {}]   ;;  %s444_s2 = inlined_call_operand.vmem [shape: s32[8,1], index: 2, kind: input, shape index: {}]   ;;  %s445_s3 = inlined_call_operand.vmem [shape: f32[8,1], index: 3, kind: output, shape index: {}]  }
   0x1   :  { %282 = vmatprep.subr.mxu0 %v337_v0  ;;  %v38_v1 = vld [vmem:[%s442_s1 + $0x78] sm:$0xff]  ;;  %314 = vmatprep.mubr.msk.f32.mxu0 %vm338_vm1, %v337_v0  ;;  %v37_v2 = vld [vmem:[%s442_s1 + $0x70] sm:$0xff]  ;;  %v36_v3 = vld [vmem:[%s442_s1 + $0x68] sm:$0xff]  ;;  %vm18_vm2 = vcmask 7168   ;;  %v340_v19 = vmov -1e+30   ;;  %v163_v20 = vlaneseq }
   0x2   :  { %283 = vmatpush3.xpose.msk.msra.mxu0 %vm39_vm0, %v38_v1  ;;  %v35_v4 = vld [vmem:[%s442_s1 + $0x60] sm:$0xff]  ;;  %v34_v5 = vld [vmem:[%s442_s1 + $0x58] sm:$0xff]  ;;  %v33_v6 = vld [vmem:[%s442_s1 + $0x50] sm:$0xff]  ;;  %321 = vset.pattern.permute.xlu0 %v339_v18  ;;  %19 = vst.msk [vmem:[#allocation2] sm:$0xff] %vm18_vm2, %v340_v19 }
   0x3   :  { %284 = vmatprep.subr.mxu0 %v337_v0  ;;  %v32_v7 = vld [vmem:[%s442_s1 + $0x48] sm:$0xff]  ;;  %v31_v8 = vld [vmem:[%s442_s1 + $0x40] sm:$0xff]  ;;  %v30_v9 = vld [vmem:[%s442_s1 + $0x38] sm:$0xff]  ;;  %322 = vset.pattern.permute.xlu1 %v339_v18  ;;  %20 = vst.msk [vmem:[#allocation3] sm:$0xff] %vm18_vm2, %v337_v0  ;;  %v164_v21 = vand.u32 127, %v163_v20 }
   0x4   :  { %v29_v10 = vld [vmem:[%s442_s1 + $0x30] sm:$0xff]  ;;  %v28_v11 = vld [vmem:[%s442_s1 + $0x28] sm:$0xff]  ;;  %v27_v12 = vld [vmem:[%s442_s1 + $0x20] sm:$0xff]  ;;  %21 = vst.msk [vmem:[#allocation4] sm:$0xff] %vm18_vm2, %v337_v0 }
   0x5   :  { %v26_v13 = vld [vmem:[%s442_s1 + $0x18] sm:$0xff]  ;;  %v25_v14 = vld [vmem:[%s442_s1 + $0x10] sm:$0xff]  ;;  %v24_v15 = vld [vmem:[%s442_s1 + $0x8] sm:$0xff]  ;;  %vm179_vm3 = vcmp.lt.s32.totalorder %v164_v21, 16 }
   0x6   :  { %285 = vmatpush3.xpose.msk.msra.mxu0 %vm39_vm0, %v37_v2  ;;  %v23_v16 = vld [vmem:[%s442_s1] sm:$0xff] }
   0x7   :  { %286 = vmatprep.subr.mxu0 %v337_v0  ;;  %v22_v17 = vld [vmem:[%s443_s0] sm:$0xff] }
   0x8   :  { %v161_v26 = vld [vmem:[%s444_s2] sm:$0xff] }
   0x9   :  { %v181_v27 = vld [vmem:[#allocation2] sm:$0xff] }
   0xa   :  { %287 = vmatpush3.xpose.msk.msra.mxu0 %vm39_vm0, %v36_v3  ;;  %v188_v63 = vld [vmem:[#allocation3] sm:$0xff] }
   0xb   :  { %288 = vmatprep.subr.mxu0 %v337_v0  ;;  %v167_v37 = vld [vmem:[#allocation4] sm:$0xff] }
   0xe   :  { %289 = vmatpush3.xpose.msk.msra.mxu0 %vm39_vm0, %v35_v4 }
   0xf   :  { %290 = vmatprep.subr.mxu0 %v337_v0 }
  0x12   :  { %291 = vmatpush3.xpose.msk.msra.mxu0 %vm39_vm0, %v34_v5 }
  0x13   :  { %292 = vmatprep.subr.mxu0 %v337_v0 }
  0x16   :  { %293 = vmatpush3.xpose.msk.msra.mxu0 %vm39_vm0, %v33_v6 }
  0x17   :  { %294 = vmatprep.subr.mxu0 %v337_v0 }
  0x1a   :  { %295 = vmatpush3.xpose.msk.msra.mxu0 %vm39_vm0, %v32_v7 }
  0x1b   :  { %296 = vmatprep.subr.mxu0 %v337_v0 }
  0x1e   :  { %297 = vmatpush3.xpose.msk.msra.mxu0 %vm39_vm0, %v31_v8 }
  0x1f   :  { %298 = vmatprep.subr.mxu0 %v337_v0 }
  0x22   :  { %299 = vmatpush3.xpose.msk.msra.mxu0 %vm39_vm0, %v30_v9 }
  0x23   :  { %300 = vmatprep.subr.mxu0 %v337_v0 }
  0x26   :  { %301 = vmatpush3.xpose.msk.msra.mxu0 %vm39_vm0, %v29_v10 }
  0x27   :  { %302 = vmatprep.subr.mxu0 %v337_v0 }
  0x2a   :  { %303 = vmatpush3.xpose.msk.msra.mxu0 %vm39_vm0, %v28_v11 }
  0x2b   :  { %304 = vmatprep.subr.mxu0 %v337_v0 }
  0x2e   :  { %305 = vmatpush3.xpose.msk.msra.mxu0 %vm39_vm0, %v27_v12 }
  0x2f   :  { %306 = vmatprep.subr.mxu0 %v337_v0 }
  0x32   :  { %307 = vmatpush3.xpose.msk.msra.mxu0 %vm39_vm0, %v26_v13 }
  0x33   :  { %308 = vmatprep.subr.mxu0 %v337_v0 }
  0x36   :  { %309 = vmatpush3.xpose.msk.msra.mxu0 %vm39_vm0, %v25_v14 }
  0x37   :  { %310 = vmatprep.subr.mxu0 %v337_v0 }
  0x3a   :  { %311 = vmatpush3.xpose.msk.msra.mxu0 %vm39_vm0, %v24_v15 }
  0x3b   :  { %312 = vmatprep.subr.mxu0 %v337_v0 }
  0x3e   :  { %313 = vmatpush3.xpose.msk.msra.mxu0 %vm39_vm0, %v23_v16 }
  0x41   :  { %315 = vmatmul.mubr.msk.f32.vlgmr.msra.gmra.mxu0 %vm39_vm0, %v22_v17 }
 0x101   :  { %v157_v22 = vpop.f32.mrf.mxu0 }
 0x102   :  { %v178_v23 = vmul.f32 64.0, %v157_v22 }
 0x103   :  { %v316_v24 = vpop.f32.mrf.mxu0 }
 0x104   :  { %v180_v25 = vsel %vm179_vm3, %v178_v23, -1e+30 }
 0x105   :  { %182 = vmax.xlane.f32.xlu0 %v180_v25 }
 0x11b   :  { %169 = vperm.xlu0 %321, %v161_v26  }
 0x18e   :  { %v183_v28 = vpop.xlane.xlu0 %182 }
 0x18f   :  { %v184_v29 = vmax.f32 %v181_v27, %v183_v28 }
 0x191   :  { %v185_v30 = vsub.f32 %v181_v27, %v184_v29  ;;  %202 = vst.msk [vmem:[#allocation2] sm:$0xff] %vm18_vm2, %v184_v29  ;;  %192 = vperm.xlu1 %322, %v184_v29  }
 0x193   :  { %v186_v52 = vmul.f32 1.442695, %v185_v30 }
 0x196   :  { %v170_v31 = vpop.permute.xlu0 %169 }
 0x197   :  { %vm171_vm4 = vcmp.eq.s32.totalorder %v164_v21, %v170_v31 }
 0x198   :  { %v172_v32 = vsel %vm171_vm4, %v157_v22, 0.0  ;;  %v222_v54 = vld [vmem:[#allocation2] sm:$0xff] }
 0x1b5   :  { %173 = vadd.xlane.f32.xlu1 %v172_v32 }
 0x20c   :  { %v193_v33 = vpop.permute.xlu1 %192 }
 0x20d   :  { %v195_v34 = vsub.f32 %v180_v25, %v193_v33 }
 0x20f   :  { %v196_v35 = vmul.f32 1.442695, %v195_v34 }
 0x211   :  { %323 = vpow2.f32 %v196_v35 }
 0x21e   :  { %v324_v36 = vpop.eup %323 }
 0x21f   :  { %198 = vadd.xlane.f32.xlu1 %v324_v36 }
 0x23e   :  { %v174_v38 = vpop.xlane.xlu1 %173 }
 0x23f   :  { %v175_v39 = vadd.f32 %v174_v38, %v167_v37 }
 0x241   :  { %177 = vst.msk [vmem:[#allocation4] sm:$0xff] %vm18_vm2, %v175_v39 }
 0x248   :  { %v206_v40 = vld [vmem:[#allocation4] sm:$0xff] }
 0x249   :  { %v264_v41 = vclamps-f32 %v206_v40, 0.9999999  ;;  %v233_v58 = vmul.f32 64.0, %v206_v40 }
 0x24b   :  { %v210_v42 = vmul.f32 %v264_v41, %v264_v41  ;;  %v209_v50 = vmul.f32 0.87758255, %v264_v41 }
 0x24d   :  { %v211_v43 = vsub.f32 1.0, %v210_v42 }
 0x24f   :  { %325 = vrsqrt.f32 %v211_v43  ;;  %vm214_vm5 = vcmp.eq.f32.partialorder %v211_v43, inf  ;;  %v217_v47 = vand.u32 2147483648, %v211_v43  ;;  %vm216_vm6 = vcmp.eq.f32.partialorder %v211_v43, 0.0 }
 0x250   :  { %327 = vpow2.f32 %v186_v52 }
 0x25c   :  { %v326_v44 = vpop.eup %325 }
 0x25d   :  { %v213_v45 = vmul.f32 %v326_v44, %v211_v43  ;;  %v328_v62 = vpop.eup %327 }
 0x25e   :  { %v189_v1 = vmul.f32 %v328_v62, %v188_v63 }
 0x25f   :  { %v215_v46 = vsel %vm214_vm5, %v211_v43, %v213_v45 }
 0x260   :  { %v218_v48 = vsel %vm216_vm6, %v217_v47, %v215_v46 }
 0x261   :  { %v219_v49 = vmul.f32 0.47942555, %v218_v48 }
 0x263   :  { %v220_v51 = vsub.f32 %v209_v50, %v219_v49 }
 0x265   :  { %v221_v53 = vmul.f32 64.0, %v220_v51 }
 0x267   :  { %v223_v55 = vmax.f32 %v222_v54, %v221_v53 }
 0x269   :  { %v228_v56 = vsub.f32 %v222_v54, %v223_v55  ;;  %v224_v57 = vsub.f32 %v221_v53, %v223_v55  ;;  %v234_v59 = vsub.f32 %v233_v58, %v223_v55 }
 0x26b   :  { %v229_v60 = vmul.f32 1.442695, %v228_v56  ;;  %v225_v61 = vmul.f32 1.442695, %v224_v57  ;;  %v235_v0 = vmul.f32 1.442695, %v234_v59 }
 0x26d   :  { %329 = vpow2.f32 %v229_v60 }
 0x26e   :  { %331 = vpow2.f32 %v225_v61 }
 0x26f   :  { %333 = vpow2.f32 %v235_v0 }
 0x27a   :  { %v330_v4 = vpop.eup %329 }
 0x27b   :  { %v332_v7 = vpop.eup %331 }
 0x27c   :  { %v334_v9 = vpop.eup %333 }
 0x2a8   :  { %v199_v2 = vpop.xlane.xlu1 %198 }
 0x2a9   :  { %v200_v3 = vadd.f32 %v199_v2, %v189_v1 }
 0x2ab   :  { %201 = vst.msk [vmem:[#allocation3] sm:$0xff] %vm18_vm2, %v200_v3 }
 0x2b2   :  { %v227_v5 = vld [vmem:[#allocation3] sm:$0xff] }
 0x2b3   :  { %v231_v6 = vmul.f32 %v330_v4, %v227_v5 }
 0x2b5   :  { %v232_v8 = vadd.f32 %v332_v7, %v231_v6 }
 0x2b7   :  { %v237_v10 = vsub.f32 %v232_v8, %v334_v9 }
 0x2b9   :  { %335 = vlog2.f32 %v237_v10 }
 0x2c6   :  { %v336_v11 = vpop.eup %335 }
 0x2c7   :  { %v239_v12 = vmul.f32 0.6931472, %v336_v11 }
 0x2c9   :  { %v240_v13 = vadd.f32 %v239_v12, %v223_v55 }
 0x2cb   :  { %v241_v14 = vsub.f32 %v221_v53, %v240_v13 }
 0x2cd   :  { %242 = vst.msk [vmem:[%s445_s3] sm:$0xff] %vm18_vm2, %v241_v14 }

</bundles_post_ra>
